<compile_context>
chip_gen: v5e
topology: v5e:2x2
jax: 0.10.0
libtpu: 0.0.40
codegen_flags: <defaults>
</compile_context>

<pallas_src>
import functools
import math

import jax
import jax.numpy as jnp
import numpy as np
from jax.experimental import pallas as pl
from jax.experimental.pallas import tpu as pltpu

D_MODEL = 32
N_HEADS = 4
HEAD_DIM = D_MODEL // N_HEADS
MAX_REL = 16                       # hard-coded in the PyTorch module
NUM_REL = 2 * MAX_REL + 1          # 33
REL_PAD = 128                      # per-head lane padding of the rel-k candidates


# ------------------------------ Pallas kernel ------------------------------ #

def fused_rel_mha_kernel(q_ref, k_ref, v_ref, wt_ref, b_ref, rk_sel_ref,
                         rv_sel_ref, rmk_ref, rmv_ref, fk_ref, fv_ref,
                         amask_ref, o_ref, *, n_heads, head_dim, seq,
                         rel_pad, inv_scale):
    wt = wt_ref[...]               # (d_model, d_model); x @ wt == x @ W.T
    bias = b_ref[...]              # (1, d_model)

    # Shared-weight q/k/v projections: three (B*L, 32) @ (32, 32) MXU matmuls.
    q2d = jnp.dot(q_ref[...], wt, preferred_element_type=jnp.float32) + bias
    k2d = jnp.dot(k_ref[...], wt, preferred_element_type=jnp.float32) + bias
    v2d = jnp.dot(v_ref[...], wt, preferred_element_type=jnp.float32) + bias

    # Relative-key candidates for ALL heads in one hoisted MXU matmul:
    #   a2cand[r, h*rel_pad + i*seq + j] = sum_d q[r, head h, d] * rel_k[idx(i,j), d]
    a2cand = jnp.dot(q2d, rk_sel_ref[...], preferred_element_type=jnp.float32)

    rmk = rmk_ref[...]             # (R, seq*seq)      row selector (i == row % seq)
    rmv = rmv_ref[...]             # (R, seq*head_dim) row selector
    fold_k = fk_ref[...]           # (seq*seq, R)      fold (i,j) -> key column j
    fold_v = fv_ref[...]           # (seq*head_dim, head_dim) fold (i,d) -> d
    rv_sel = rv_sel_ref[...]       # (R, seq*head_dim) rel-v candidate weights
    amask = amask_ref[...]         # (R, R) additive mask: 0 valid / -1e30 elsewhere

    ctx_parts = []
    for h in range(n_heads):       # 4 unrolled iterations, (16, .) operands
        c0 = h * head_dim
        qh = q2d[:, c0:c0 + head_dim]
        kh = k2d[:, c0:c0 + head_dim]
        vh = v2d[:, c0:c0 + head_dim]

        # content-content scores: trans_b matmul, no explicit transpose.
        attn1 = jax.lax.dot_general(qh, kh, (((1,), (1,)), ((), ())),
                                    preferred_element_type=jnp.float32)

        # content-position scores: 128-aligned candidate slice, then
        # row-select (VPU mul) + fold (MXU matmul).  No 3-D one-hot, no XLU gather.
        cand = a2cand[:, h * rel_pad:h * rel_pad + seq * seq]
        attn2 = jnp.dot(cand * rmk, fold_k, preferred_element_type=jnp.float32)

        scores = (attn1 + attn2) * inv_scale + amask
        m = jnp.max(scores, axis=-1, keepdims=True)
        p = jnp.exp(scores - m)                      # cross-batch / masked -> exact 0
        s = jnp.sum(p, axis=-1, keepdims=True)
        inv_s = pl.reciprocal(s, approx=True)        # EUP fast path
        inv_s = inv_s * (2.0 - s * inv_s)            # one Newton step -> f32 exact
        attn = p * inv_s
        # TODO(synk): dropout(p=0.1) after softmax omitted — identity at eval time.

        w1 = jnp.dot(attn, vh, preferred_element_type=jnp.float32)        # (R, hd)
        w2cand = jnp.dot(attn, rv_sel, preferred_element_type=jnp.float32)  # (R, seq*hd)
        w2 = jnp.dot(w2cand * rmv, fold_v, preferred_element_type=jnp.float32)
        ctx_parts.append(w1 + w2)

    ctx = jnp.concatenate(ctx_parts, axis=1)         # (R, d_model), registers only
    # Fused output projection (shared weight), one contiguous lane-dense store.
    o_ref[...] = jnp.dot(ctx, wt, preferred_element_type=jnp.float32) + bias


# ------------------------------- glue (JAX) -------------------------------- #

@jax.jit
def relative_mha_forward(query, key, value, mask, params):
    B, L, _ = query.shape
    wt = params["W"].T                         # (d_in, d_out): x @ wt == x @ W.T
    bias = params["b"].reshape(1, D_MODEL)

    # Gathered relative-position tables (tiny, computed once outside the kernel).
    idx = jnp.clip(jnp.arange(L)[None, :] - jnp.arange(L)[:, None],
                   -MAX_REL, MAX_REL) + MAX_REL                   # (L, L)
    rk_g = params["rel_k"][idx]                                   # (L, L, hd)
    rv_g = params["rel_v"][idx]                                   # (L, L, hd)

    # rel-k candidate weight, head-block-diagonal, 128-lane padded per head:
    #   rk_sel[h*hd + d, h*REL_PAD + i*L + j] = rel_k[idx(i, j), d]
    blk = rk_g.transpose(2, 0, 1).reshape(HEAD_DIM, L * L)
    blk = jnp.pad(blk, ((0, 0), (0, REL_PAD - L * L)))
    rk_sel = jnp.kron(jnp.eye(N_HEADS, dtype=jnp.float32), blk)   # (32, H*128)

    # rel-v candidate weight: rv_sel[b*L + j, i*hd + d] = rel_v[idx(i, j), d]
    rv_sel = jnp.tile(rv_g.transpose(1, 0, 2).reshape(L, L * HEAD_DIM), (B, 1))

    # 0/1 row selectors (i == row % L) and fold matrices (MXU/VPU operands).
    rmk = jnp.tile(jnp.kron(jnp.eye(L, dtype=jnp.float32),
                            jnp.ones((1, L), jnp.float32)), (B, 1))          # (B*L, L*L)
    rmv = jnp.tile(jnp.kron(jnp.eye(L, dtype=jnp.float32),
                            jnp.ones((1, HEAD_DIM), jnp.float32)), (B, 1))   # (B*L, L*hd)
    fold_v = jnp.tile(jnp.eye(HEAD_DIM, dtype=jnp.float32), (L, 1))          # (L*hd, hd)
    fold_k = jnp.tile(jnp.tile(jnp.eye(L, dtype=jnp.float32), (L, 1)), (1, B))  # (L*L, B*L)

    # Additive mask, block-diagonal over batches: 0 where attended, -1e30 elsewhere
    # (kills both masked positions and cross-batch score columns).
    valid = (mask != 0).astype(jnp.float32)
    big = jnp.einsum('bij,bc->bicj', valid, jnp.eye(B, dtype=jnp.float32))
    amask = jnp.where(big.reshape(B * L, B * L) > 0.5,
                      jnp.float32(0.0), jnp.float32(-1e30))

    q2 = query.reshape(B * L, D_MODEL)
    k2 = key.reshape(B * L, D_MODEL)
    v2 = value.reshape(B * L, D_MODEL)

    kernel = functools.partial(
        fused_rel_mha_kernel, n_heads=N_HEADS, head_dim=HEAD_DIM, seq=L,
        rel_pad=REL_PAD, inv_scale=1.0 / math.sqrt(HEAD_DIM))

    vmem = pl.BlockSpec(memory_space=pltpu.MemorySpace.VMEM)
    out2d = pl.pallas_call(
        kernel,
        out_shape=jax.ShapeDtypeStruct((B * L, D_MODEL), jnp.float32),
        in_specs=[vmem] * 12,
        out_specs=vmem,
    )(q2, k2, v2, wt, bias, rk_sel, rv_sel, rmk, rmv, fold_k, fold_v, amask)
    return out2d.reshape(B, L, D_MODEL)


def relative_position_embeddings(table, length_q, length_k, max_rel):
    dist = jnp.arange(length_k)[None, :] - jnp.arange(length_q)[:, None]
    idx = jnp.clip(dist, -max_rel, max_rel) + max_rel
    return jnp.take(table, idx, axis=0)        # (Lq, Lk, num_units)


def reference_forward(query, key, value, mask, params):
    """Pure-JAX mirror of the PyTorch forward, for correctness checking."""
    W, b = params["W"], params["b"]
    B, L, _ = query.shape

    def proj(x):
        return x @ W.T + b

    q, k, v = proj(query), proj(key), proj(value)

    def split_heads(x):
        return x.reshape(B, L, N_HEADS, HEAD_DIM).transpose(0, 2, 1, 3)

    qh, kh, vh = split_heads(q), split_heads(k), split_heads(v)
    rel_k = relative_position_embeddings(params["rel_k"], L, L, MAX_REL)
    rel_v = relative_position_embeddings(params["rel_v"], L, L, MAX_REL)

    attn1 = jnp.einsum('bhid,bhjd->bhij', qh, kh)
    attn2 = jnp.einsum('bhid,ijd->bhij', qh, rel_k)
    attn = (attn1 + attn2) / math.sqrt(HEAD_DIM)
    attn = jnp.where(mask[:, None, :, :] == 0, -1e30, attn)
    attn = jax.nn.softmax(attn, axis=-1)
    w1 = jnp.einsum('bhij,bhjd->bhid', attn, vh)
    w2 = jnp.einsum('bhij,ijd->bhid', attn, rel_v)
    x = (w1 + w2).transpose(0, 2, 1, 3).reshape(B, L, D_MODEL)
    return x @ W.T + b


# --------------------------------- main ------------------------------------ #

if __name__ == "__main__":
    B, L = 2, 8
    key0 = jax.random.PRNGKey(0)
    k_w, k_b, k_rk, k_rv, k_q, k_k, k_v = jax.random.split(key0, 7)

    lin_bound = 1.0 / math.sqrt(D_MODEL)                 # ~ nn.Linear default
    W = jax.random.uniform(k_w, (D_MODEL, D_MODEL), jnp.float32,
                           -lin_bound, lin_bound)
    b = jax.random.uniform(k_b, (D_MODEL,), jnp.float32, -lin_bound, lin_bound)
    xav = math.sqrt(6.0 / (NUM_REL + HEAD_DIM))          # xavier_uniform bound
    rel_k_table = jax.random.uniform(k_rk, (NUM_REL, HEAD_DIM),
                                     jnp.float32, -xav, xav)
    rel_v_table = jax.random.uniform(k_rv, (NUM_REL, HEAD_DIM),
                                     jnp.float32, -xav, xav)
    params = {"W": W, "b": b, "rel_k": rel_k_table, "rel_v": rel_v_table}

    query = jax.random.normal(k_q, (B, L, D_MODEL), jnp.float32)
    key_in = jax.random.normal(k_k, (B, L, D_MODEL), jnp.float32)
    value = jax.random.normal(k_v, (B, L, D_MODEL), jnp.float32)
    # Causal mask (B, L, L); PyTorch forward unsqueezes it to (B, 1, L, L).
    mask = jnp.broadcast_to(
        jnp.tril(jnp.ones((L, L), jnp.int32)), (B, L, L)).astype(jnp.int32)

    out = relative_mha_forward(query, key_in, value, mask, params)
    out = jax.block_until_ready(out)

    ref = reference_forward(query, key_in, value, mask, params)
    np.testing.assert_allclose(np.asarray(out), np.asarray(ref),
                               rtol=1e-4, atol=1e-4)
    print("KERNEL_OK")
</pallas_src>

<mosaic_0001>
module attributes {stable_mosaic.version = 11 : i64} {
  func.func @fused_rel_mha_kernel(%arg0: memref<16x32xf32, #tpu.memory_space<vmem>>, %arg1: memref<16x32xf32, #tpu.memory_space<vmem>>, %arg2: memref<16x32xf32, #tpu.memory_space<vmem>>, %arg3: memref<32x32xf32, #tpu.memory_space<vmem>>, %arg4: memref<1x32xf32, #tpu.memory_space<vmem>>, %arg5: memref<32x512xf32, #tpu.memory_space<vmem>>, %arg6: memref<16x64xf32, #tpu.memory_space<vmem>>, %arg7: memref<16x64xf32, #tpu.memory_space<vmem>>, %arg8: memref<16x64xf32, #tpu.memory_space<vmem>>, %arg9: memref<64x16xf32, #tpu.memory_space<vmem>>, %arg10: memref<64x8xf32, #tpu.memory_space<vmem>>, %arg11: memref<16x16xf32, #tpu.memory_space<vmem>>, %arg12: memref<16x32xf32, #tpu.memory_space<vmem>>) attributes {dimension_semantics = [], scalar_prefetch = 0 : i64, scratch_operands = 0 : i64, tpu.core_type = #tpu.core_type<tc>} {
    %c0 = arith.constant 0 : index
    %c0_0 = arith.constant 0 : index
    %0 = vector.load %arg3[%c0, %c0_0] : memref<32x32xf32, #tpu.memory_space<vmem>>, vector<32x32xf32>
    %c0_1 = arith.constant 0 : index
    %c0_2 = arith.constant 0 : index
    %1 = vector.load %arg4[%c0_1, %c0_2] : memref<1x32xf32, #tpu.memory_space<vmem>>, vector<1x32xf32>
    %c0_3 = arith.constant 0 : index
    %c0_4 = arith.constant 0 : index
    %2 = vector.load %arg0[%c0_3, %c0_4] : memref<16x32xf32, #tpu.memory_space<vmem>>, vector<16x32xf32>
    %cst = arith.constant dense<0.000000e+00> : vector<16x32xf32>
    %3 = tpu.matmul %2, %0, %cst {dimension_numbers = #tpu.dot_dimension_numbers<[1], [0], [0], [1], [0, 0, 1, 1], [], []>} : vector<16x32xf32>, vector<32x32xf32>, vector<16x32xf32> -> vector<16x32xf32>
    %4 = vector.broadcast %1 : vector<1x32xf32> to vector<16x32xf32>
    %5 = arith.addf %3, %4 : vector<16x32xf32>
    %c0_5 = arith.constant 0 : index
    %c0_6 = arith.constant 0 : index
    %6 = vector.load %arg1[%c0_5, %c0_6] : memref<16x32xf32, #tpu.memory_space<vmem>>, vector<16x32xf32>
    %cst_7 = arith.constant dense<0.000000e+00> : vector<16x32xf32>
    %7 = tpu.matmul %6, %0, %cst_7 {dimension_numbers = #tpu.dot_dimension_numbers<[1], [0], [0], [1], [0, 0, 1, 1], [], []>} : vector<16x32xf32>, vector<32x32xf32>, vector<16x32xf32> -> vector<16x32xf32>
    %8 = vector.broadcast %1 : vector<1x32xf32> to vector<16x32xf32>
    %9 = arith.addf %7, %8 : vector<16x32xf32>
    %c0_8 = arith.constant 0 : index
    %c0_9 = arith.constant 0 : index
    %10 = vector.load %arg2[%c0_8, %c0_9] : memref<16x32xf32, #tpu.memory_space<vmem>>, vector<16x32xf32>
    %cst_10 = arith.constant dense<0.000000e+00> : vector<16x32xf32>
    %11 = tpu.matmul %10, %0, %cst_10 {dimension_numbers = #tpu.dot_dimension_numbers<[1], [0], [0], [1], [0, 0, 1, 1], [], []>} : vector<16x32xf32>, vector<32x32xf32>, vector<16x32xf32> -> vector<16x32xf32>
    %12 = vector.broadcast %1 : vector<1x32xf32> to vector<16x32xf32>
    %13 = arith.addf %11, %12 : vector<16x32xf32>
    %c0_11 = arith.constant 0 : index
    %c0_12 = arith.constant 0 : index
    %14 = vector.load %arg5[%c0_11, %c0_12] : memref<32x512xf32, #tpu.memory_space<vmem>>, vector<32x512xf32>
    %cst_13 = arith.constant dense<0.000000e+00> : vector<16x512xf32>
    %15 = tpu.matmul %5, %14, %cst_13 {dimension_numbers = #tpu.dot_dimension_numbers<[1], [0], [0], [1], [0, 0, 1, 1], [], []>} : vector<16x32xf32>, vector<32x512xf32>, vector<16x512xf32> -> vector<16x512xf32>
    %c0_14 = arith.constant 0 : index
    %c0_15 = arith.constant 0 : index
    %16 = vector.load %arg7[%c0_14, %c0_15] : memref<16x64xf32, #tpu.memory_space<vmem>>, vector<16x64xf32>
    %c0_16 = arith.constant 0 : index
    %c0_17 = arith.constant 0 : index
    %17 = vector.load %arg8[%c0_16, %c0_17] : memref<16x64xf32, #tpu.memory_space<vmem>>, vector<16x64xf32>
    %c0_18 = arith.constant 0 : index
    %c0_19 = arith.constant 0 : index
    %18 = vector.load %arg9[%c0_18, %c0_19] : memref<64x16xf32, #tpu.memory_space<vmem>>, vector<64x16xf32>
    %c0_20 = arith.constant 0 : index
    %c0_21 = arith.constant 0 : index
    %19 = vector.load %arg10[%c0_20, %c0_21] : memref<64x8xf32, #tpu.memory_space<vmem>>, vector<64x8xf32>
    %c0_22 = arith.constant 0 : index
    %c0_23 = arith.constant 0 : index
    %20 = vector.load %arg6[%c0_22, %c0_23] : memref<16x64xf32, #tpu.memory_space<vmem>>, vector<16x64xf32>
    %c0_24 = arith.constant 0 : index
    %c0_25 = arith.constant 0 : index
    %21 = vector.load %arg11[%c0_24, %c0_25] : memref<16x16xf32, #tpu.memory_space<vmem>>, vector<16x16xf32>
    %22 = vector.extract_strided_slice %5 {offsets = [0, 0], sizes = [16, 8], strides = [1, 1]} : vector<16x32xf32> to vector<16x8xf32>
    %23 = vector.extract_strided_slice %9 {offsets = [0, 0], sizes = [16, 8], strides = [1, 1]} : vector<16x32xf32> to vector<16x8xf32>
    %24 = vector.extract_strided_slice %13 {offsets = [0, 0], sizes = [16, 8], strides = [1, 1]} : vector<16x32xf32> to vector<16x8xf32>
    %cst_26 = arith.constant dense<0.000000e+00> : vector<16x16xf32>
    %25 = tpu.matmul %22, %23, %cst_26 {dimension_numbers = #tpu.dot_dimension_numbers<[1], [1], [0], [0], [0, 0, 1, 0], [], []>} : vector<16x8xf32>, vector<16x8xf32>, vector<16x16xf32> -> vector<16x16xf32>
    %26 = vector.extract_strided_slice %15 {offsets = [0, 0], sizes = [16, 64], strides = [1, 1]} : vector<16x512xf32> to vector<16x64xf32>
    %27 = arith.mulf %26, %16 : vector<16x64xf32>
    %cst_27 = arith.constant dense<0.000000e+00> : vector<16x16xf32>
    %28 = tpu.matmul %27, %18, %cst_27 {dimension_numbers = #tpu.dot_dimension_numbers<[1], [0], [0], [1], [0, 0, 1, 1], [], []>} : vector<16x64xf32>, vector<64x16xf32>, vector<16x16xf32> -> vector<16x16xf32>
    %29 = arith.addf %25, %28 : vector<16x16xf32>
    %cst_28 = arith.constant 0.353553385 : f32
    %30 = vector.broadcast %cst_28 : f32 to vector<16x16xf32>
    %31 = arith.mulf %29, %30 : vector<16x16xf32>
    %32 = arith.addf %31, %21 : vector<16x16xf32>
    %cst_29 = arith.constant dense<0xFF800000> : vector<16xf32>
    %33 = vector.multi_reduction <maximumf>, %32, %cst_29 [1] : vector<16x16xf32> to vector<16xf32>
    %34 = vector.shape_cast %33 : vector<16xf32> to vector<16x1xf32>
    %35 = vector.broadcast %34 : vector<16x1xf32> to vector<16x16xf32>
    %36 = arith.subf %32, %35 : vector<16x16xf32>
    %37 = math.exp %36 : vector<16x16xf32>
    %cst_30 = arith.constant dense<0.000000e+00> : vector<16xf32>
    %38 = vector.multi_reduction <add>, %37, %cst_30 [1] : vector<16x16xf32> to vector<16xf32>
    %39 = vector.shape_cast %38 : vector<16xf32> to vector<16x1xf32>
    %40 = tpu.reciprocal %39 {approx = true} : vector<16x1xf32> -> vector<16x1xf32>
    %41 = arith.mulf %39, %40 : vector<16x1xf32>
    %cst_31 = arith.constant 2.000000e+00 : f32
    %42 = vector.broadcast %cst_31 : f32 to vector<16x1xf32>
    %43 = arith.subf %42, %41 : vector<16x1xf32>
    %44 = arith.mulf %40, %43 : vector<16x1xf32>
    %45 = vector.broadcast %44 : vector<16x1xf32> to vector<16x16xf32>
    %46 = arith.mulf %37, %45 : vector<16x16xf32>
    %cst_32 = arith.constant dense<0.000000e+00> : vector<16x8xf32>
    %47 = tpu.matmul %46, %24, %cst_32 {dimension_numbers = #tpu.dot_dimension_numbers<[1], [0], [0], [1], [0, 0, 1, 1], [], []>} : vector<16x16xf32>, vector<16x8xf32>, vector<16x8xf32> -> vector<16x8xf32>
    %cst_33 = arith.constant dense<0.000000e+00> : vector<16x64xf32>
    %48 = tpu.matmul %46, %20, %cst_33 {dimension_numbers = #tpu.dot_dimension_numbers<[1], [0], [0], [1], [0, 0, 1, 1], [], []>} : vector<16x16xf32>, vector<16x64xf32>, vector<16x64xf32> -> vector<16x64xf32>
    %49 = arith.mulf %48, %17 : vector<16x64xf32>
    %cst_34 = arith.constant dense<0.000000e+00> : vector<16x8xf32>
    %50 = tpu.matmul %49, %19, %cst_34 {dimension_numbers = #tpu.dot_dimension_numbers<[1], [0], [0], [1], [0, 0, 1, 1], [], []>} : vector<16x64xf32>, vector<64x8xf32>, vector<16x8xf32> -> vector<16x8xf32>
    %51 = arith.addf %47, %50 : vector<16x8xf32>
    %52 = vector.extract_strided_slice %5 {offsets = [0, 8], sizes = [16, 8], strides = [1, 1]} : vector<16x32xf32> to vector<16x8xf32>
    %53 = vector.extract_strided_slice %9 {offsets = [0, 8], sizes = [16, 8], strides = [1, 1]} : vector<16x32xf32> to vector<16x8xf32>
    %54 = vector.extract_strided_slice %13 {offsets = [0, 8], sizes = [16, 8], strides = [1, 1]} : vector<16x32xf32> to vector<16x8xf32>
    %cst_35 = arith.constant dense<0.000000e+00> : vector<16x16xf32>
    %55 = tpu.matmul %52, %53, %cst_35 {dimension_numbers = #tpu.dot_dimension_numbers<[1], [1], [0], [0], [0, 0, 1, 0], [], []>} : vector<16x8xf32>, vector<16x8xf32>, vector<16x16xf32> -> vector<16x16xf32>
    %56 = vector.extract_strided_slice %15 {offsets = [0, 128], sizes = [16, 64], strides = [1, 1]} : vector<16x512xf32> to vector<16x64xf32>
    %57 = arith.mulf %56, %16 : vector<16x64xf32>
    %cst_36 = arith.constant dense<0.000000e+00> : vector<16x16xf32>
    %58 = tpu.matmul %57, %18, %cst_36 {dimension_numbers = #tpu.dot_dimension_numbers<[1], [0], [0], [1], [0, 0, 1, 1], [], []>} : vector<16x64xf32>, vector<64x16xf32>, vector<16x16xf32> -> vector<16x16xf32>
    %59 = arith.addf %55, %58 : vector<16x16xf32>
    %cst_37 = arith.constant 0.353553385 : f32
    %60 = vector.broadcast %cst_37 : f32 to vector<16x16xf32>
    %61 = arith.mulf %59, %60 : vector<16x16xf32>
    %62 = arith.addf %61, %21 : vector<16x16xf32>
    %cst_38 = arith.constant dense<0xFF800000> : vector<16xf32>
    %63 = vector.multi_reduction <maximumf>, %62, %cst_38 [1] : vector<16x16xf32> to vector<16xf32>
    %64 = vector.shape_cast %63 : vector<16xf32> to vector<16x1xf32>
    %65 = vector.broadcast %64 : vector<16x1xf32> to vector<16x16xf32>
    %66 = arith.subf %62, %65 : vector<16x16xf32>
    %67 = math.exp %66 : vector<16x16xf32>
    %cst_39 = arith.constant dense<0.000000e+00> : vector<16xf32>
    %68 = vector.multi_reduction <add>, %67, %cst_39 [1] : vector<16x16xf32> to vector<16xf32>
    %69 = vector.shape_cast %68 : vector<16xf32> to vector<16x1xf32>
    %70 = tpu.reciprocal %69 {approx = true} : vector<16x1xf32> -> vector<16x1xf32>
    %71 = arith.mulf %69, %70 : vector<16x1xf32>
    %cst_40 = arith.constant 2.000000e+00 : f32
    %72 = vector.broadcast %cst_40 : f32 to vector<16x1xf32>
    %73 = arith.subf %72, %71 : vector<16x1xf32>
    %74 = arith.mulf %70, %73 : vector<16x1xf32>
    %75 = vector.broadcast %74 : vector<16x1xf32> to vector<16x16xf32>
    %76 = arith.mulf %67, %75 : vector<16x16xf32>
    %cst_41 = arith.constant dense<0.000000e+00> : vector<16x8xf32>
    %77 = tpu.matmul %76, %54, %cst_41 {dimension_numbers = #tpu.dot_dimension_numbers<[1], [0], [0], [1], [0, 0, 1, 1], [], []>} : vector<16x16xf32>, vector<16x8xf32>, vector<16x8xf32> -> vector<16x8xf32>
    %cst_42 = arith.constant dense<0.000000e+00> : vector<16x64xf32>
    %78 = tpu.matmul %76, %20, %cst_42 {dimension_numbers = #tpu.dot_dimension_numbers<[1], [0], [0], [1], [0, 0, 1, 1], [], []>} : vector<16x16xf32>, vector<16x64xf32>, vector<16x64xf32> -> vector<16x64xf32>
    %79 = arith.mulf %78, %17 : vector<16x64xf32>
    %cst_43 = arith.constant dense<0.000000e+00> : vector<16x8xf32>
    %80 = tpu.matmul %79, %19, %cst_43 {dimension_numbers = #tpu.dot_dimension_numbers<[1], [0], [0], [1], [0, 0, 1, 1], [], []>} : vector<16x64xf32>, vector<64x8xf32>, vector<16x8xf32> -> vector<16x8xf32>
    %81 = arith.addf %77, %80 : vector<16x8xf32>
    %82 = vector.extract_strided_slice %5 {offsets = [0, 16], sizes = [16, 8], strides = [1, 1]} : vector<16x32xf32> to vector<16x8xf32>
    %83 = vector.extract_strided_slice %9 {offsets = [0, 16], sizes = [16, 8], strides = [1, 1]} : vector<16x32xf32> to vector<16x8xf32>
    %84 = vector.extract_strided_slice %13 {offsets = [0, 16], sizes = [16, 8], strides = [1, 1]} : vector<16x32xf32> to vector<16x8xf32>
    %cst_44 = arith.constant dense<0.000000e+00> : vector<16x16xf32>
    %85 = tpu.matmul %82, %83, %cst_44 {dimension_numbers = #tpu.dot_dimension_numbers<[1], [1], [0], [0], [0, 0, 1, 0], [], []>} : vector<16x8xf32>, vector<16x8xf32>, vector<16x16xf32> -> vector<16x16xf32>
    %86 = vector.extract_strided_slice %15 {offsets = [0, 256], sizes = [16, 64], strides = [1, 1]} : vector<16x512xf32> to vector<16x64xf32>
    %87 = arith.mulf %86, %16 : vector<16x64xf32>
    %cst_45 = arith.constant dense<0.000000e+00> : vector<16x16xf32>
    %88 = tpu.matmul %87, %18, %cst_45 {dimension_numbers = #tpu.dot_dimension_numbers<[1], [0], [0], [1], [0, 0, 1, 1], [], []>} : vector<16x64xf32>, vector<64x16xf32>, vector<16x16xf32> -> vector<16x16xf32>
    %89 = arith.addf %85, %88 : vector<16x16xf32>
    %cst_46 = arith.constant 0.353553385 : f32
    %90 = vector.broadcast %cst_46 : f32 to vector<16x16xf32>
    %91 = arith.mulf %89, %90 : vector<16x16xf32>
    %92 = arith.addf %91, %21 : vector<16x16xf32>
    %cst_47 = arith.constant dense<0xFF800000> : vector<16xf32>
    %93 = vector.multi_reduction <maximumf>, %92, %cst_47 [1] : vector<16x16xf32> to vector<16xf32>
    %94 = vector.shape_cast %93 : vector<16xf32> to vector<16x1xf32>
    %95 = vector.broadcast %94 : vector<16x1xf32> to vector<16x16xf32>
    %96 = arith.subf %92, %95 : vector<16x16xf32>
    %97 = math.exp %96 : vector<16x16xf32>
    %cst_48 = arith.constant dense<0.000000e+00> : vector<16xf32>
    %98 = vector.multi_reduction <add>, %97, %cst_48 [1] : vector<16x16xf32> to vector<16xf32>
    %99 = vector.shape_cast %98 : vector<16xf32> to vector<16x1xf32>
    %100 = tpu.reciprocal %99 {approx = true} : vector<16x1xf32> -> vector<16x1xf32>
    %101 = arith.mulf %99, %100 : vector<16x1xf32>
    %cst_49 = arith.constant 2.000000e+00 : f32
    %102 = vector.broadcast %cst_49 : f32 to vector<16x1xf32>
    %103 = arith.subf %102, %101 : vector<16x1xf32>
    %104 = arith.mulf %100, %103 : vector<16x1xf32>
    %105 = vector.broadcast %104 : vector<16x1xf32> to vector<16x16xf32>
    %106 = arith.mulf %97, %105 : vector<16x16xf32>
    %cst_50 = arith.constant dense<0.000000e+00> : vector<16x8xf32>
    %107 = tpu.matmul %106, %84, %cst_50 {dimension_numbers = #tpu.dot_dimension_numbers<[1], [0], [0], [1], [0, 0, 1, 1], [], []>} : vector<16x16xf32>, vector<16x8xf32>, vector<16x8xf32> -> vector<16x8xf32>
    %cst_51 = arith.constant dense<0.000000e+00> : vector<16x64xf32>
    %108 = tpu.matmul %106, %20, %cst_51 {dimension_numbers = #tpu.dot_dimension_numbers<[1], [0], [0], [1], [0, 0, 1, 1], [], []>} : vector<16x16xf32>, vector<16x64xf32>, vector<16x64xf32> -> vector<16x64xf32>
    %109 = arith.mulf %108, %17 : vector<16x64xf32>
    %cst_52 = arith.constant dense<0.000000e+00> : vector<16x8xf32>
    %110 = tpu.matmul %109, %19, %cst_52 {dimension_numbers = #tpu.dot_dimension_numbers<[1], [0], [0], [1], [0, 0, 1, 1], [], []>} : vector<16x64xf32>, vector<64x8xf32>, vector<16x8xf32> -> vector<16x8xf32>
    %111 = arith.addf %107, %110 : vector<16x8xf32>
    %112 = vector.extract_strided_slice %5 {offsets = [0, 24], sizes = [16, 8], strides = [1, 1]} : vector<16x32xf32> to vector<16x8xf32>
    %113 = vector.extract_strided_slice %9 {offsets = [0, 24], sizes = [16, 8], strides = [1, 1]} : vector<16x32xf32> to vector<16x8xf32>
    %114 = vector.extract_strided_slice %13 {offsets = [0, 24], sizes = [16, 8], strides = [1, 1]} : vector<16x32xf32> to vector<16x8xf32>
    %cst_53 = arith.constant dense<0.000000e+00> : vector<16x16xf32>
    %115 = tpu.matmul %112, %113, %cst_53 {dimension_numbers = #tpu.dot_dimension_numbers<[1], [1], [0], [0], [0, 0, 1, 0], [], []>} : vector<16x8xf32>, vector<16x8xf32>, vector<16x16xf32> -> vector<16x16xf32>
    %116 = vector.extract_strided_slice %15 {offsets = [0, 384], sizes = [16, 64], strides = [1, 1]} : vector<16x512xf32> to vector<16x64xf32>
    %117 = arith.mulf %116, %16 : vector<16x64xf32>
    %cst_54 = arith.constant dense<0.000000e+00> : vector<16x16xf32>
    %118 = tpu.matmul %117, %18, %cst_54 {dimension_numbers = #tpu.dot_dimension_numbers<[1], [0], [0], [1], [0, 0, 1, 1], [], []>} : vector<16x64xf32>, vector<64x16xf32>, vector<16x16xf32> -> vector<16x16xf32>
    %119 = arith.addf %115, %118 : vector<16x16xf32>
    %cst_55 = arith.constant 0.353553385 : f32
    %120 = vector.broadcast %cst_55 : f32 to vector<16x16xf32>
    %121 = arith.mulf %119, %120 : vector<16x16xf32>
    %122 = arith.addf %121, %21 : vector<16x16xf32>
    %cst_56 = arith.constant dense<0xFF800000> : vector<16xf32>
    %123 = vector.multi_reduction <maximumf>, %122, %cst_56 [1] : vector<16x16xf32> to vector<16xf32>
    %124 = vector.shape_cast %123 : vector<16xf32> to vector<16x1xf32>
    %125 = vector.broadcast %124 : vector<16x1xf32> to vector<16x16xf32>
    %126 = arith.subf %122, %125 : vector<16x16xf32>
    %127 = math.exp %126 : vector<16x16xf32>
    %cst_57 = arith.constant dense<0.000000e+00> : vector<16xf32>
    %128 = vector.multi_reduction <add>, %127, %cst_57 [1] : vector<16x16xf32> to vector<16xf32>
    %129 = vector.shape_cast %128 : vector<16xf32> to vector<16x1xf32>
    %130 = tpu.reciprocal %129 {approx = true} : vector<16x1xf32> -> vector<16x1xf32>
    %131 = arith.mulf %129, %130 : vector<16x1xf32>
    %cst_58 = arith.constant 2.000000e+00 : f32
    %132 = vector.broadcast %cst_58 : f32 to vector<16x1xf32>
    %133 = arith.subf %132, %131 : vector<16x1xf32>
    %134 = arith.mulf %130, %133 : vector<16x1xf32>
    %135 = vector.broadcast %134 : vector<16x1xf32> to vector<16x16xf32>
    %136 = arith.mulf %127, %135 : vector<16x16xf32>
    %cst_59 = arith.constant dense<0.000000e+00> : vector<16x8xf32>
    %137 = tpu.matmul %136, %114, %cst_59 {dimension_numbers = #tpu.dot_dimension_numbers<[1], [0], [0], [1], [0, 0, 1, 1], [], []>} : vector<16x16xf32>, vector<16x8xf32>, vector<16x8xf32> -> vector<16x8xf32>
    %cst_60 = arith.constant dense<0.000000e+00> : vector<16x64xf32>
    %138 = tpu.matmul %136, %20, %cst_60 {dimension_numbers = #tpu.dot_dimension_numbers<[1], [0], [0], [1], [0, 0, 1, 1], [], []>} : vector<16x16xf32>, vector<16x64xf32>, vector<16x64xf32> -> vector<16x64xf32>
    %139 = arith.mulf %138, %17 : vector<16x64xf32>
    %cst_61 = arith.constant dense<0.000000e+00> : vector<16x8xf32>
    %140 = tpu.matmul %139, %19, %cst_61 {dimension_numbers = #tpu.dot_dimension_numbers<[1], [0], [0], [1], [0, 0, 1, 1], [], []>} : vector<16x64xf32>, vector<64x8xf32>, vector<16x8xf32> -> vector<16x8xf32>
    %141 = arith.addf %137, %140 : vector<16x8xf32>
    %142 = tpu.concatenate %51, %81, %111, %141 in 1 : vector<16x8xf32>, vector<16x8xf32>, vector<16x8xf32>, vector<16x8xf32> -> vector<16x32xf32>
    %cst_62 = arith.constant dense<0.000000e+00> : vector<16x32xf32>
    %143 = tpu.matmul %142, %0, %cst_62 {dimension_numbers = #tpu.dot_dimension_numbers<[1], [0], [0], [1], [0, 0, 1, 1], [], []>} : vector<16x32xf32>, vector<32x32xf32>, vector<16x32xf32> -> vector<16x32xf32>
    %144 = vector.broadcast %1 : vector<1x32xf32> to vector<16x32xf32>
    %145 = arith.addf %143, %144 : vector<16x32xf32>
    %c0_63 = arith.constant 0 : index
    %c0_64 = arith.constant 0 : index
    %146 = vector.load %arg12[%c0_63, %c0_64] : memref<16x32xf32, #tpu.memory_space<vmem>>, vector<16x32xf32>
    tpu.vector_store %arg12[%c0_63, %c0_64], %145 {strides = array<i32>} : memref<16x32xf32, #tpu.memory_space<vmem>>, vector<16x32xf32>,
    return
  }
}

</mosaic_0001>

<bundles_post_ra>
// kernel: relative_mha_forward.1
= control target key start
LH: loop header
LB: loop body
LE: loop exit
PB: predicated region body
PF: predicated region fallthrough
CT: control target
= control target key end

     0   :  { %vm52_vm0 = vcmask 261120   ;;  %s1854_s0 = inlined_call_operand.vmem [shape: f32[16,32], index: 0, kind: input, shape index: {}]   ;;  %s1855_s1 = inlined_call_operand.vmem [shape: f32[16,32], index: 1, kind: input, shape index: {}]   ;;  %s1856_s2 = inlined_call_operand.vmem [shape: f32[16,32], index: 2, kind: input, shape index: {}]   ;;  %s1857_s3 = inlined_call_operand.vmem [shape: f32[32,32], index: 3, kind: input, shape index: {}]   ;;  %s1858_s4 = inlined_call_operand.vmem [shape: f32[1,32], index: 4, kind: input, shape index: {}]   ;;  %s1859_s5 = inlined_call_operand.vmem [shape: f32[32,512], index: 5, kind: input, shape index: {}]   ;;  %s1860_s6 = inlined_call_operand.vmem [shape: f32[16,64], index: 6, kind: input, shape index: {}]   ;;  %s1861_s7 = inlined_call_operand.vmem [shape: f32[16,64], index: 7, kind: input, shape index: {}, may-alias: {7,8}]   ;;  %s1862_s8 = inlined_call_operand.vmem [shape: f32[16,64], index: 8, kind: input, shape index: {}, may-alias: {7,8}]   ;;  %s1863_s9 = inlined_call_operand.vmem [shape: f32[64,16], index: 9, kind: input, shape index: {}]   ;;  %s1864_s10 = inlined_call_operand.vmem [shape: f32[64,8], index: 10, kind: input, shape index: {}]   ;;  %s1865_s11 = inlined_call_operand.vmem [shape: f32[16,16], index: 11, kind: input, shape index: {}]   ;;  %s1866_s12 = inlined_call_operand.hbm [shape: f32[16,32], index: 12, kind: output, shape index: {}]  }
   0x1   :  { %v1341_v0 = vld [vmem:[%s1857_s3 + $0x18] sm:$0xff]  ;;  %v1346_v1 = vld [vmem:[%s1857_s3 + $0x10] sm:$0xff]  ;;  %v1353_v2 = vld [vmem:[%s1857_s3 + $0x8] sm:$0xff] }
   0x2   :  { %71 = vmatpush.msra.mxu0 %v1341_v0  ;;  %102 = vmatpush.msra.mxu1 %v1341_v0  ;;  %v156_v3 = vld [vmem:[%s1859_s5 + $0x60] sm:$0xff]  ;;  %v157_v8 = vld [vmem:[%s1859_s5 + $0x68] sm:$0xff] }
   0x3   :  { %133 = vmatpush.msra.mxu2 %v1341_v0  ;;  %v1364_v4 = vld [vmem:[%s1857_s3] sm:$0xff]  ;;  %178 = vmatpush.msra.mxu3 %v156_v3 }
   0x4   :  { %72 = vmatpush.msra.mxu0 %v1346_v1  ;;  %103 = vmatpush.msra.mxu1 %v1346_v1  ;;  %v152_v5 = vld [vmem:[%s1859_s5 + $0x40] sm:$0xff] }
   0x5   :  { %134 = vmatpush.msra.mxu2 %v1346_v1  ;;  %v47_v6 = vld [vmem:[%s1854_s0] sm:$0xff]  ;;  %179 = vmatpush.msra.mxu3 %v152_v5 }
   0x6   :  { %73 = vmatpush.msra.mxu0 %v1353_v2  ;;  %104 = vmatpush.msra.mxu1 %v1353_v2  ;;  %v82_v7 = vld [vmem:[%s1855_s1] sm:$0xff] }
   0x7   :  { %135 = vmatpush.msra.mxu2 %v1353_v2 }
   0x8   :  { %17 = vsyncpa [#allocation3], 0  ;;  %74 = vmatpush.msra.mxu0 %v1364_v4  ;;  %105 = vmatpush.msra.mxu1 %v1364_v4  ;;  %v113_v9 = vld [vmem:[%s1856_s2] sm:$0xff]  ;;  %v158_v10 = vld [vmem:[%s1859_s5 + $0x70] sm:$0xff]  ;;  %vm314_vm1 = vcmask 64512   ;;  %vm284_vm2 = vcmask 523264  }
   0x9   :  { %1119 = vmatmul.msk.f32.vlgmr.msra.gmra.mxu0 %vm52_vm0, %v47_v6  ;;  %1121 = vmatmul.msk.f32.vlgmr.msra.gmra.mxu1 %vm52_vm0, %v82_v7  ;;  %v159_v11 = vld [vmem:[%s1859_s5 + $0x78] sm:$0xff]  ;;  %v153_v12 = vld [vmem:[%s1859_s5 + $0x48] sm:$0xff]  ;;  %v154_v13 = vld [vmem:[%s1859_s5 + $0x50] sm:$0xff]  ;;  %vm352_vm3 = vcmask 130048   ;;  %s1269_s13 = smov 16   ;;  %vm1067_vm4 = vcmask 195584  }
   0xa   :  { %136 = vmatpush.msra.mxu2 %v1364_v4  ;;  %201 = vmatpush.msrb.mxu0 %v157_v8  ;;  %v155_v14 = vld [vmem:[%s1859_s5 + $0x58] sm:$0xff]  ;;  %v48_v15 = vld [vmem:[%s1854_s0 + $0x8] sm:$0xff]  ;;  %v148_v18 = vld [vmem:[%s1859_s5 + $0x20] sm:$0xff]  ;;  %s1271_s14 = smov [#allocation2]   ;;  %s1107_s17 = sshll.u32 %s1866_s12, 4  ;;  %s1108_s17 = int_to_ptr.hbm [resolvable:$true] %s1107_s17 }
   0xb   :  { %1123 = vmatmul.msk.f32.vlgmr.msra.gmra.mxu2 %vm52_vm0, %v113_v9  ;;  %224 = vmatpush.msrb.mxu1 %v158_v10  ;;  %v83_v16 = vld [vmem:[%s1855_s1 + $0x8] sm:$0xff]  ;;  %v150_v20 = vld [vmem:[%s1859_s5 + $0x30] sm:$0xff]  ;;  %v151_v21 = vld [vmem:[%s1859_s5 + $0x38] sm:$0xff]  ;;  %s1105_s15 = sshll.u32 %s1271_s14, 4  ;;  %s1106_s15 = int_to_ptr.vmem [resolvable:$true] %s1105_s15 }
   0xc   :  { %247 = vmatpush.msrb.mxu2 %v159_v11  ;;  %202 = vmatpush.msrb.mxu0 %v153_v12  ;;  %v114_v17 = vld [vmem:[%s1856_s2 + $0x8] sm:$0xff]  ;;  %v144_v22 = vld [vmem:[%s1859_s5] sm:$0xff]  ;;  %v146_v24 = vld [vmem:[%s1859_s5 + $0x10] sm:$0xff]  ;;  %s1265_s2 = smov 120  }
   0xd   :  { %225 = vmatpush.msrb.mxu1 %v154_v13  ;;  %v149_v19 = vld [vmem:[%s1859_s5 + $0x28] sm:$0xff]  ;;  %180 = vmatpush.msra.mxu3 %v148_v18  ;;  %v147_v25 = vld [vmem:[%s1859_s5 + $0x18] sm:$0xff]  ;;  %v1450_v27 = vld [vmem:[%s1858_s4] ss:$0 sm:$0xff] }
   0xe   :  { %248 = vmatpush.msrb.mxu2 %v155_v14  ;;  %203 = vmatpush.msrb.mxu0 %v149_v19  ;;  %v145_v23 = vld [vmem:[%s1859_s5 + $0x8] sm:$0xff]  ;;  %v1445_v26 = vld [vmem:[%s1863_s9 + $0x38] sm:$0xff]  ;;  %v1456_v28 = vld [vmem:[%s1863_s9 + $0x30] sm:$0xff] }
   0xf   :  { %226 = vmatpush.msrb.mxu1 %v150_v20  ;;  %181 = vmatpush.msra.mxu3 %v144_v22  ;;  %v1462_v31 = vld [vmem:[%s1863_s9 + $0x28] sm:$0xff]  ;;  %v1479_v33 = vld [vmem:[%s1863_s9 + $0x20] sm:$0xff]  ;;  %v1485_v34 = vld [vmem:[%s1863_s9 + $0x18] sm:$0xff] }
  0x10   :  { %249 = vmatpush.msrb.mxu2 %v151_v21  ;;  %204 = vmatpush.msrb.mxu0 %v145_v23  ;;  %v1491_v37 = vld [vmem:[%s1863_s9 + $0x10] sm:$0xff]  ;;  %v1535_v44 = vld [vmem:[%s1863_s9 + $0x8] sm:$0xff]  ;;  %v1545_v46 = vld [vmem:[%s1863_s9] sm:$0xff]  ;;  %s1267_s9 = smov 104  }
  0x11   :  { %1120 = vmatmul.msk.f32.gmra.mxu0 %vm52_vm0, %v48_v15  ;;  %1122 = vmatmul.msk.f32.gmra.mxu1 %vm52_vm0, %v83_v16  ;;  %v1554_v48 = vld [vmem:[%s1860_s6 + $0x8] sm:$0xff]  ;;  %v1559_v49 = vld [vmem:[%s1860_s6] sm:$0xff]  ;;  %s1270_s6 = smov 24  }
  0x12   :  { %227 = vmatpush.msrb.mxu1 %v146_v24  ;;  %250 = vmatpush.msrb.mxu2 %v147_v25  ;;  %v1567_v50 = vld [vmem:[%s1861_s7] sm:$0xff]  ;;  %v1575_v55 = vld [vmem:[%s1861_s7 + $0x8] sm:$0xff] }
  0x13   :  { %1124 = vmatmul.msk.f32.gmra.mxu2 %vm52_vm0, %v114_v17  ;;  %299 = vmatpush.msrb.mxu3 %v1445_v26  ;;  %v1586_v3 = vld [vmem:[%s1865_s11] sm:$0xff]  ;;  %v1593_v11 = vld [vmem:[%s1865_s11 + $0x8] sm:$0xff]  ;;  %s1272_s11 = smov 128  }
  0x14   :  { %401 = vmatpush.msra.mxu1 %v1554_v48 }
  0x15   :  { %300 = vmatpush.msrb.mxu3 %v1456_v28 }
  0x16   :  { %402 = vmatpush.msra.mxu1 %v1559_v49 }
  0x17   :  { %301 = vmatpush.msrb.mxu3 %v1462_v31 }
  0x19   :  { %302 = vmatpush.msrb.mxu3 %v1479_v33 }
  0x1b   :  { %303 = vmatpush.msrb.mxu3 %v1485_v34 }
  0x1d   :  { %304 = vmatpush.msrb.mxu3 %v1491_v37 }
  0x1f   :  { %305 = vmatpush.msrb.mxu3 %v1535_v44 }
  0x21   :  { %306 = vmatpush.msrb.mxu3 %v1545_v46 }
  0x86   :  { %v76_v29 = vpop.f32.mrf.mxu0  ;;  %v107_v30 = vpop.f32.mrf.mxu1 }
  0x87   :  { %v1465_v32 = vadd.f32 %v1450_v27, %v76_v29  ;;  %v1509_v40 = vadd.f32 %v1450_v27, %v107_v30 }
  0x89   :  { %1125 = vmatmul.msk.f32.vlgmr.msra.gmra.mxu3 %vm52_vm0, %v1465_v32  ;;  %1127 = vmatmul.msk.f32.vlgmr.msrb.gmra.mxu0 %vm52_vm0, %v1465_v32 }
  0x8a   :  { %1129 = vmatmul.msk.f32.vlgmr.msrb.gmra.mxu1 %vm52_vm0, %v1465_v32  ;;  %1131 = vmatmul.msk.f32.vlgmr.msrb.gmra.mxu2 %vm52_vm0, %v1465_v32 }
  0x8e   :  { %v79_v35 = vpop.f32.mrf.mxu0  ;;  %v110_v36 = vpop.f32.mrf.mxu1 }
  0x8f   :  { %v1494_v38 = vadd.f32 %v1450_v27, %v79_v35  ;;  %v1497_v39 = vadd.f32 %v1450_v27, %v110_v36  ;;  %v138_v41 = vpop.f32.mrf.mxu2 }
  0x90   :  { %v1540_v45 = vadd.f32 %v1450_v27, %v138_v41 }
  0x91   :  { %1126 = vmatmul.msk.f32.gmra.mxu3 %vm52_vm0, %v1494_v38  ;;  %1128 = vmatmul.msk.f32.gmra.mxu0 %vm52_vm0, %v1494_v38 }
  0x92   :  { %1130 = vmatmul.msk.f32.gmra.mxu1 %vm52_vm0, %v1494_v38  ;;  %1132 = vmatmul.msk.f32.gmra.mxu2 %vm52_vm0, %v1494_v38 }
  0x93   :  { %1135 = vmatpush.xpose.msk.msra.mxu0 %vm314_vm1, %v1497_v39  ;;  %501 = vrot.lane.b32.xlu2 %v1497_v39, %s1265_s2 }
  0x97   :  { %1136 = vmatpush.xpose.msk.msra.mxu0 %vm314_vm1, %v1509_v40  ;;  %v141_v42 = vpop.f32.mrf.mxu2 }
  0x98   :  { %v1530_v43 = vadd.f32 %v1450_v27, %v141_v42 }
  0x9a   :  { %1137 = vmatmul.msk.f32.vlgmr.msra.gmra.mxu0 %vm314_vm1, %v1465_v32  ;;  %455 = vmatpush.msra.mxu3 %v1530_v43 }
  0x9b   :  { %480 = vmatpush.msrb.mxu0 %v1445_v26  ;;  %499 = vrot.lane.b32.xlu2 %v1509_v40, %s1265_s2 }
  0x9c   :  { %456 = vmatpush.msra.mxu3 %v1540_v45 }
  0x9d   :  { %481 = vmatpush.msrb.mxu0 %v1456_v28 }
  0x9f   :  { %482 = vmatpush.msrb.mxu0 %v1462_v31 }
  0xa1   :  { %483 = vmatpush.msrb.mxu0 %v1479_v33 }
  0xa2   :  { %1138 = vmatmul.msk.f32.gmra.mxu0 %vm314_vm1, %v1494_v38 }
  0xa3   :  { %484 = vmatpush.msrb.mxu0 %v1485_v34 }
  0xa5   :  { %485 = vmatpush.msrb.mxu0 %v1491_v37 }
  0xa7   :  { %486 = vmatpush.msrb.mxu0 %v1535_v44 }
  0xa9   :  { %487 = vmatpush.msrb.mxu0 %v1545_v46 }
  0xed   :  { %v502_v47 = vpop.permute.xlu2 %501 }
  0xee   :  { %1147 = vmatpush.xpose.msk.msrb.mxu1 %vm314_vm1, %v502_v47 }
  0xf5   :  { %v500_v53 = vpop.permute.xlu2 %499 }
  0xf6   :  { %1148 = vmatpush.xpose.msk.msrb.mxu1 %vm314_vm1, %v500_v53 }
 0x106   :  { %v206_v51 = vpop.f32.mrf.mxu0 }
 0x107   :  { %v464_v52 = vmul.f32 %v1567_v50, %v206_v51 }
 0x109   :  { %1145 = vmatmul.msk.f32.vlgmr.msrb.gmra.mxu0 %vm284_vm2, %v464_v52 }
 0x10c   :  { %v183_v54 = vpop.f32.mrf.mxu3 }
 0x10d   :  { %v282_v56 = vmul.f32 %v1567_v50, %v183_v54 }
 0x10e   :  { %v209_v57 = vpop.f32.mrf.mxu0 }
 0x10f   :  { %v465_v58 = vmul.f32 %v1575_v55, %v209_v57  ;;  %1133 = vmatmul.msk.f32.vlgmr.msrb.gmra.mxu3 %vm284_vm2, %v282_v56  ;;  %v1614_v56 = vld [vmem:[%s1864_s10 + $0x38] sm:$0xff]  ;;  %v1619_v57 = vld [vmem:[%s1864_s10 + $0x30] sm:$0xff] }
 0x110   :  { %426 = vmatpush.msra.mxu2 %v1614_v56  ;;  %611 = vmatpush.msrb.mxu3 %v1614_v56 }
 0x111   :  { %1146 = vmatmul.msk.f32.gmra.mxu0 %vm284_vm2, %v465_v58  ;;  %v1626_v58 = vld [vmem:[%s1864_s10 + $0x28] sm:$0xff] }
 0x112   :  { %427 = vmatpush.msra.mxu2 %v1619_v57  ;;  %612 = vmatpush.msrb.mxu3 %v1619_v57 }
 0x114   :  { %v186_v59 = vpop.f32.mrf.mxu3  ;;  %428 = vmatpush.msra.mxu2 %v1626_v58  ;;  %613 = vmatpush.msrb.mxu3 %v1626_v58 }
 0x115   :  { %v283_v60 = vmul.f32 %v1575_v55, %v186_v59  ;;  %v1634_v59 = vld [vmem:[%s1864_s10 + $0x20] sm:$0xff] }
 0x116   :  { %429 = vmatpush.msra.mxu2 %v1634_v59  ;;  %614 = vmatpush.msrb.mxu3 %v1634_v59 }
 0x117   :  { %1134 = vmatmul.msk.f32.gmra.mxu3 %vm284_vm2, %v283_v60  ;;  %v342_v61 = vpop.f32.mrf.mxu0  ;;  %v1642_v60 = vld [vmem:[%s1864_s10 + $0x18] sm:$0xff] }
 0x118   :  { %430 = vmatpush.msra.mxu2 %v1642_v60  ;;  %615 = vmatpush.msrb.mxu3 %v1642_v60 }
 0x11f   :  { %v345_v8 = vpop.f32.mrf.mxu0 }
 0x192   :  { %v308_v62 = vpop.f32.mrf.mxu3 }
 0x193   :  { %v343_v63 = vadd.f32 %v342_v61, %v308_v62  ;;  %v1651_v62 = vld [vmem:[%s1864_s10 + $0x10] sm:$0xff] }
 0x194   :  { %431 = vmatpush.msra.mxu2 %v1651_v62  ;;  %616 = vmatpush.msrb.mxu3 %v1651_v62 }
 0x195   :  { %v348_v5 = vmul.f32 0.35355338, %v343_v63 }
 0x197   :  { %v350_v6 = vadd.f32 %v348_v5, %v1586_v3  ;;  %v229_v5 = vpop.f32.mrf.mxu1 }
 0x199   :  { %v353_v7 = vsel %vm352_vm3, %v350_v6, -inf }
 0x19a   :  { %354 = vmax.xlane.f32.xlu0 %v353_v7  ;;  %v311_v9 = vpop.f32.mrf.mxu3 }
 0x19b   :  { %v346_v10 = vadd.f32 %v345_v8, %v311_v9  ;;  %v1666_v9 = vld [vmem:[%s1864_s10 + $0x8] sm:$0xff] }
 0x19c   :  { %432 = vmatpush.msra.mxu2 %v1666_v9  ;;  %617 = vmatpush.msrb.mxu3 %v1666_v9 }
 0x19d   :  { %v349_v12 = vmul.f32 0.35355338, %v346_v10  ;;  %v1672_v10 = vld [vmem:[%s1864_s10] sm:$0xff] }
 0x19e   :  { %433 = vmatpush.msra.mxu2 %v1672_v10  ;;  %618 = vmatpush.msrb.mxu3 %v1672_v10 }
 0x19f   :  { %v351_v13 = vadd.f32 %v349_v12, %v1593_v11  ;;  %v232_v7 = vpop.f32.mrf.mxu1  ;;  %v1684_v12 = vld [vmem:[%s1862_s8] sm:$0xff] }
 0x1a0   :  { %v658_v8 = vmul.f32 %v1575_v55, %v232_v7  ;;  %586 = vmatpush.msrb.mxu2 %v1554_v48 }
 0x1a1   :  { %v356_v14 = vsel %vm352_vm3, %v351_v13, -inf }
 0x1a2   :  { %357 = vmax.xlane.f32.xlu0 %v356_v14  ;;  %587 = vmatpush.msrb.mxu2 %v1559_v49 }
 0x1b6   :  { %495 = vrot.lane.b32.xlu0 %v1465_v32, %s1265_s2 }
 0x20d   :  { %v355_v15 = vpop.xlane.xlu0 %354 }
 0x20e   :  { %v359_v16 = vsub.f32 %v350_v6, %v355_v15  ;;  %v657_v6 = vmul.f32 %v1567_v50, %v229_v5  ;;  %v1691_v15 = vld [vmem:[%s1862_s8 + $0x8] sm:$0xff]  ;;  %s1266_s8 = smov 112  }
 0x210   :  { %v361_v17 = vmul.f32 1.442695, %v359_v16 }
 0x212   :  { %1207 = vpow2.f32 %v361_v17 }
 0x215   :  { %v358_v18 = vpop.xlane.xlu0 %357 }
 0x216   :  { %v360_v19 = vsub.f32 %v351_v13, %v358_v18  ;;  %v489_v18 = vpop.f32.mrf.mxu0 }
 0x218   :  { %v1208_v20 = vpop.eup %1207  ;;  %v363_v21 = vmul.f32 1.442695, %v360_v19 }
 0x219   :  { %v365_v22 = vsel %vm352_vm3, %v1208_v20, 0.0 }
 0x21a   :  { %1209 = vpow2.f32 %v363_v21  ;;  %366 = vadd.xlane.f32.xlu1 %v365_v22 }
 0x220   :  { %v1210_v23 = vpop.eup %1209 }
 0x221   :  { %v368_v24 = vsel %vm352_vm3, %v1210_v23, 0.0 }
 0x222   :  { %369 = vadd.xlane.f32.xlu1 %v368_v24  ;;  %v492_v24 = vpop.f32.mrf.mxu0 }
 0x228   :  { %v496_v61 = vpop.permute.xlu0 %495 }
 0x23b   :  { %497 = vrot.lane.b32.xlu1 %v1494_v38, %s1265_s2 }
 0x28d   :  { %v367_v25 = vpop.xlane.xlu1 %366 }
 0x28e   :  { %1211 = vrcp.f32 %v367_v25 }
 0x294   :  { %v1212_v29 = vpop.eup %1211 }
 0x295   :  { %v373_v30 = vmul.f32 %v1212_v29, %v367_v25  ;;  %v370_v35 = vpop.xlane.xlu1 %369 }
 0x296   :  { %1213 = vrcp.f32 %v370_v35 }
 0x297   :  { %v375_v36 = vsub.f32 2.0, %v373_v30 }
 0x299   :  { %v377_v41 = vmul.f32 %v1212_v29, %v375_v36 }
 0x29b   :  { %v379_v42 = vmul.f32 %v1208_v20, %v377_v41 }
 0x29c   :  { %v1214_v47 = vpop.eup %1213 }
 0x29d   :  { %v374_v51 = vmul.f32 %v1214_v47, %v370_v35  ;;  %1139 = vmatmul.msk.f32.vlgmr.msra.gmra.mxu1 %vm352_vm3, %v379_v42  ;;  %1143 = vmatmul.msk.f32.vlgmr.msra.gmra.mxu3 %vm352_vm3, %v379_v42 }
 0x29e   :  { %673 = vmatpush.msra.mxu1 %v1445_v26  ;;  %779 = vmatpush.msra.mxu3 %v1554_v48 }
 0x29f   :  { %v376_v52 = vsub.f32 2.0, %v374_v51 }
 0x2a0   :  { %674 = vmatpush.msra.mxu1 %v1456_v28  ;;  %780 = vmatpush.msra.mxu3 %v1559_v49 }
 0x2a1   :  { %v378_v53 = vmul.f32 %v1214_v47, %v376_v52 }
 0x2a2   :  { %675 = vmatpush.msra.mxu1 %v1462_v31 }
 0x2a3   :  { %v380_v54 = vmul.f32 %v1210_v23, %v378_v53 }
 0x2a4   :  { %676 = vmatpush.msra.mxu1 %v1479_v33 }
 0x2a5   :  { %1140 = vmatmul.msk.f32.gmra.mxu1 %vm352_vm3, %v380_v54  ;;  %1144 = vmatmul.msk.f32.gmra.mxu3 %vm352_vm3, %v380_v54 }
 0x2a6   :  { %677 = vmatpush.msra.mxu1 %v1485_v34 }
 0x2a8   :  { %678 = vmatpush.msra.mxu1 %v1491_v37 }
 0x2aa   :  { %679 = vmatpush.msra.mxu1 %v1535_v44 }
 0x2ac   :  { %680 = vmatpush.msra.mxu1 %v1545_v46 }
 0x2ad   :  { %1149 = vmatmul.msk.f32.vlgmr.msrb.gmra.mxu1 %vm314_vm1, %v496_v61  ;;  %v498_v63 = vpop.permute.xlu1 %497 }
 0x2b5   :  { %1150 = vmatmul.msk.f32.gmra.mxu1 %vm314_vm1, %v498_v63 }
 0x2bd   :  { %1157 = vmatmul.msk.f32.vlgmr.msra.gmra.mxu1 %vm284_vm2, %v657_v6 }
 0x2c5   :  { %1158 = vmatmul.msk.f32.gmra.mxu1 %vm284_vm2, %v658_v8 }
 0x31a   :  { %v404_v13 = vpop.f32.mrf.mxu1 }
 0x31b   :  { %v410_v14 = vmul.f32 %v404_v13, %v1684_v12 }
 0x31d   :  { %1141 = vmatmul.msk.f32.vlgmr.msra.gmra.mxu2 %vm284_vm2, %v410_v14 }
 0x322   :  { %v407_v16 = vpop.f32.mrf.mxu1 }
 0x323   :  { %v411_v17 = vmul.f32 %v407_v16, %v1691_v15 }
 0x325   :  { %1142 = vmatmul.msk.f32.gmra.mxu2 %vm284_vm2, %v411_v17 }
 0x32a   :  { %v528_v19 = vpop.f32.mrf.mxu1 }
 0x32b   :  { %v529_v20 = vadd.f32 %v528_v19, %v489_v18 }
 0x32d   :  { %v534_v21 = vmul.f32 0.35355338, %v529_v20 }
 0x32f   :  { %v536_v22 = vadd.f32 %v534_v21, %v1586_v3 }
 0x331   :  { %v538_v23 = vsel %vm352_vm3, %v536_v22, -inf }
 0x332   :  { %v531_v25 = vpop.f32.mrf.mxu1  ;;  %539 = vmax.xlane.f32.xlu2 %v538_v23 }
 0x333   :  { %v532_v29 = vadd.f32 %v531_v25, %v492_v24 }
 0x335   :  { %v535_v30 = vmul.f32 0.35355338, %v532_v29 }
 0x337   :  { %v537_v35 = vadd.f32 %v535_v30, %v1593_v11 }
 0x339   :  { %v541_v36 = vsel %vm352_vm3, %v537_v35, -inf }
 0x33a   :  { %542 = vmax.xlane.f32.xlu0 %v541_v36 }
 0x34a   :  { %694 = vrot.lane.b32.xlu2 %v1497_v39, %s1266_s8 }
 0x34e   :  { %692 = vrot.lane.b32.xlu0 %v1509_v40, %s1266_s8 }
 0x3a5   :  { %v540_v41 = vpop.xlane.xlu2 %539 }
 0x3a6   :  { %v544_v42 = vsub.f32 %v536_v22, %v540_v41 }
 0x3a8   :  { %v546_v47 = vmul.f32 1.442695, %v544_v42 }
 0x3aa   :  { %1215 = vpow2.f32 %v546_v47 }
 0x3ad   :  { %v543_v51 = vpop.xlane.xlu0 %542  ;;  %v695_v52 = vpop.permute.xlu2 %694 }
 0x3ae   :  { %v545_v53 = vsub.f32 %v537_v35, %v543_v51  ;;  %1159 = vmatpush.xpose.msk.msra.mxu2 %vm314_vm1, %v695_v52 }
 0x3b0   :  { %v1216_v54 = vpop.eup %1215  ;;  %v548_v61 = vmul.f32 1.442695, %v545_v53 }
 0x3b1   :  { %v550_v63 = vsel %vm352_vm3, %v1216_v54, 0.0 }
 0x3b2   :  { %1217 = vpow2.f32 %v548_v61  ;;  %551 = vadd.xlane.f32.xlu1 %v550_v63 }
 0x3b8   :  { %v1218_v5 = vpop.eup %1217 }
 0x3b9   :  { %v553_v6 = vsel %vm352_vm3, %v1218_v5, 0.0 }
 0x3ba   :  { %554 = vadd.xlane.f32.xlu2 %v553_v6 }
 0x3c0   :  { %v693_v7 = vpop.permute.xlu0 %692 }
 0x3c1   :  { %1160 = vmatpush.xpose.msk.msra.mxu2 %vm314_vm1, %v693_v7 }
 0x3cb   :  { %688 = vrot.lane.b32.xlu1 %v1465_v32, %s1266_s8 }
 0x3d2   :  { %690 = vrot.lane.b32.xlu2 %v1494_v38, %s1266_s8 }
 0x425   :  { %v552_v8 = vpop.xlane.xlu1 %551 }
 0x426   :  { %1219 = vrcp.f32 %v552_v8 }
 0x42c   :  { %v1220_v13 = vpop.eup %1219 }
 0x42d   :  { %v558_v14 = vmul.f32 %v1220_v13, %v552_v8  ;;  %v555_v16 = vpop.xlane.xlu2 %554 }
 0x42e   :  { %1221 = vrcp.f32 %v555_v16 }
 0x42f   :  { %v560_v17 = vsub.f32 2.0, %v558_v14 }
 0x431   :  { %v562_v18 = vmul.f32 %v1220_v13, %v560_v17 }
 0x433   :  { %v1711_v19 = vmul.f32 %v1216_v54, %v562_v18 }
 0x434   :  { %v1222_v20 = vpop.eup %1221 }
 0x435   :  { %v559_v21 = vmul.f32 %v1222_v20, %v555_v16  ;;  %1151 = vmatmul.msk.f32.vlgmr.msrb.gmra.mxu2 %vm352_vm3, %v1711_v19 }
 0x436   :  { %864 = vmatpush.msrb.mxu2 %v1445_v26 }
 0x437   :  { %v561_v22 = vsub.f32 2.0, %v559_v21 }
 0x438   :  { %865 = vmatpush.msrb.mxu2 %v1456_v28  ;;  %v691_v28 = vpop.permute.xlu2 %690 }
 0x439   :  { %v563_v23 = vmul.f32 %v1222_v20, %v561_v22 }
 0x43a   :  { %866 = vmatpush.msrb.mxu2 %v1462_v31  ;;  %v252_v31 = vpop.f32.mrf.mxu2 }
 0x43b   :  { %v1718_v24 = vmul.f32 %v1218_v5, %v563_v23 }
 0x43c   :  { %867 = vmatpush.msrb.mxu2 %v1479_v33  ;;  %v848_v33 = vmul.f32 %v1567_v50, %v252_v31  ;;  %v682_v50 = vpop.f32.mrf.mxu1 }
 0x43d   :  { %1152 = vmatmul.msk.f32.gmra.mxu2 %vm352_vm3, %v1718_v24  ;;  %v689_v26 = vpop.permute.xlu1 %688 }
 0x43e   :  { %868 = vmatpush.msrb.mxu2 %v1485_v34 }
 0x440   :  { %869 = vmatpush.msrb.mxu2 %v1491_v37 }
 0x442   :  { %870 = vmatpush.msrb.mxu2 %v1535_v44  ;;  %v255_v25 = vpop.f32.mrf.mxu2 }
 0x443   :  { %v849_v34 = vmul.f32 %v1575_v55, %v255_v25 }
 0x444   :  { %871 = vmatpush.msrb.mxu2 %v1545_v46  ;;  %v685_v51 = vpop.f32.mrf.mxu1 }
 0x445   :  { %1161 = vmatmul.msk.f32.vlgmr.msra.gmra.mxu2 %vm314_vm1, %v689_v26 }
 0x44a   :  { %v1733_v37 = vpop.f32.mrf.mxu2 }
 0x44d   :  { %1162 = vmatmul.msk.f32.gmra.mxu2 %vm314_vm1, %v691_v28 }
 0x452   :  { %v1735_v44 = vpop.f32.mrf.mxu2 }
 0x455   :  { %1169 = vmatmul.msk.f32.vlgmr.msrb.gmra.mxu2 %vm284_vm2, %v848_v33 }
 0x45d   :  { %1170 = vmatmul.msk.f32.gmra.mxu2 %vm284_vm2, %v849_v34 }
 0x4b8   :  { %v589_v46 = vpop.f32.mrf.mxu2 }
 0x4b9   :  { %v595_v29 = vmul.f32 %v589_v46, %v1684_v12 }
 0x4bb   :  { %1153 = vmatmul.msk.f32.vlgmr.msrb.gmra.mxu3 %vm284_vm2, %v595_v29 }
 0x4c0   :  { %v592_v30 = vpop.f32.mrf.mxu2 }
 0x4c1   :  { %v596_v35 = vmul.f32 %v592_v30, %v1691_v15 }
 0x4c3   :  { %1154 = vmatmul.msk.f32.gmra.mxu3 %vm284_vm2, %v596_v35 }
 0x4c8   :  { %v721_v36 = vpop.f32.mrf.mxu2 }
 0x4c9   :  { %v722_v41 = vadd.f32 %v721_v36, %v682_v50 }
 0x4cb   :  { %v727_v55 = vmul.f32 0.35355338, %v722_v41 }
 0x4cd   :  { %v729_v42 = vadd.f32 %v727_v55, %v1586_v3 }
 0x4cf   :  { %v731_v47 = vsel %vm352_vm3, %v729_v42, -inf }
 0x4d0   :  { %732 = vmax.xlane.f32.xlu2 %v731_v47  ;;  %v724_v52 = vpop.f32.mrf.mxu2 }
 0x4d1   :  { %v725_v53 = vadd.f32 %v724_v52, %v685_v51 }
 0x4d3   :  { %v728_v54 = vmul.f32 0.35355338, %v725_v53 }
 0x4d5   :  { %v730_v61 = vadd.f32 %v728_v54, %v1593_v11 }
 0x4d7   :  { %v734_v63 = vsel %vm352_vm3, %v730_v61, -inf }
 0x4d8   :  { %735 = vmax.xlane.f32.xlu0 %v734_v63 }
 0x4ec   :  { %885 = vrot.lane.b32.xlu0 %v1497_v39, %s1267_s9 }
 0x4f4   :  { %881 = vrot.lane.b32.xlu0 %v1494_v38, %s1267_s9  ;;  %v1756_v38 = vpack.i.bf16 %v1540_v45, %v1530_v43 }
 0x543   :  { %v733_v5 = vpop.xlane.xlu2 %732 }
 0x544   :  { %v737_v6 = vsub.f32 %v729_v42, %v733_v5 }
 0x546   :  { %v739_v7 = vmul.f32 1.442695, %v737_v6 }
 0x548   :  { %1223 = vpow2.f32 %v739_v7 }
 0x54b   :  { %v736_v8 = vpop.xlane.xlu0 %735 }
 0x54c   :  { %v738_v13 = vsub.f32 %v730_v61, %v736_v8 }
 0x54e   :  { %v1224_v14 = vpop.eup %1223  ;;  %v741_v16 = vmul.f32 1.442695, %v738_v13 }
 0x54f   :  { %v743_v17 = vsel %vm352_vm3, %v1224_v14, 0.0 }
 0x550   :  { %1225 = vpow2.f32 %v741_v16  ;;  %744 = vadd.xlane.f32.xlu1 %v743_v17 }
 0x556   :  { %v1226_v18 = vpop.eup %1225 }
 0x557   :  { %v746_v20 = vsel %vm352_vm3, %v1226_v18, 0.0 }
 0x558   :  { %747 = vadd.xlane.f32.xlu2 %v746_v20 }
 0x55e   :  { %v886_v39 = vpop.permute.xlu0 %885 }
 0x55f   :  { %1171 = vmatpush.xpose.msk.msrb.mxu3 %vm314_vm1, %v886_v39 }
 0x569   :  { %879 = vrot.lane.b32.xlu1 %v1465_v32, %s1267_s9 }
 0x570   :  { %883 = vrot.lane.b32.xlu2 %v1509_v40, %s1267_s9 }
 0x571   :  { %1192 = vrot.lane.b32.xlu1 %v1756_v38, %s1265_s2  ;;  %s1268_s2 = smov 8  }
 0x5c3   :  { %v745_v21 = vpop.xlane.xlu1 %744 }
 0x5c4   :  { %1227 = vrcp.f32 %v745_v21 }
 0x5ca   :  { %v1228_v22 = vpop.eup %1227 }
 0x5cb   :  { %v751_v23 = vmul.f32 %v1228_v22, %v745_v21  ;;  %v748_v26 = vpop.xlane.xlu2 %747 }
 0x5cc   :  { %1229 = vrcp.f32 %v748_v26 }
 0x5cd   :  { %v753_v28 = vsub.f32 2.0, %v751_v23 }
 0x5cf   :  { %v755_v31 = vmul.f32 %v1228_v22, %v753_v28 }
 0x5d1   :  { %v1762_v33 = vmul.f32 %v1224_v14, %v755_v31 }
 0x5d2   :  { %v1230_v32 = vpop.eup %1229 }
 0x5d3   :  { %v752_v25 = vmul.f32 %v1230_v32, %v748_v26  ;;  %1163 = vmatmul.msk.f32.vlgmr.msra.gmra.mxu3 %vm352_vm3, %v1762_v33  ;;  %v884_v43 = vpop.permute.xlu2 %883 }
 0x5d4   :  { %1172 = vmatpush.xpose.msk.msrb.mxu3 %vm314_vm1, %v884_v43 }
 0x5d5   :  { %v754_v40 = vsub.f32 2.0, %v752_v25 }
 0x5d7   :  { %v756_v45 = vmul.f32 %v1230_v32, %v754_v40 }
 0x5d8   :  { %1088 = vmatpush.msra.mxu3 %v1341_v0  ;;  %v882_v0 = vpop.permute.xlu0 %881 }
 0x5d9   :  { %v1769_v34 = vmul.f32 %v1226_v18, %v756_v45 }
 0x5da   :  { %1089 = vmatpush.msra.mxu3 %v1346_v1  ;;  %v1791_v1 = vpop.f32.mrf.mxu3 }
 0x5db   :  { %v880_v46 = vpop.permute.xlu1 %879  ;;  %1164 = vmatmul.msk.f32.gmra.mxu3 %vm352_vm3, %v1769_v34 }
 0x5dc   :  { %1090 = vmatpush.msra.mxu3 %v1353_v2 }
 0x5de   :  { %1091 = vmatpush.msra.mxu3 %v1364_v4 }
 0x5e2   :  { %v1793_v2 = vpop.f32.mrf.mxu3 }
 0x5e3   :  { %v1193_v29 = vpop.permute.xlu1 %1192  ;;  %1173 = vmatmul.msk.f32.vlgmr.msrb.gmra.mxu3 %vm314_vm1, %v880_v46 }
 0x5e4   :  { %v1194_v30 = vunpack.i.l.bf16 %v1193_v29  ;;  %v1195_v35 = vunpack.i.h.bf16 %v1193_v29 }
 0x5e6   :  { %648 = vmatpush.msra.mxu0 %v1194_v30 }
 0x5e8   :  { %649 = vmatpush.msra.mxu0 %v1195_v35 }
 0x5e9   :  { %1155 = vmatmul.msk.f32.vlgmr.msra.gmra.mxu0 %vm352_vm3, %v1711_v19 }
 0x5ea   :  { %804 = vmatpush.msrb.mxu0 %v1614_v56  ;;  %v620_v4 = vpop.f32.mrf.mxu3 }
 0x5eb   :  { %1174 = vmatmul.msk.f32.gmra.mxu3 %vm314_vm1, %v882_v0 }
 0x5ec   :  { %805 = vmatpush.msrb.mxu0 %v1619_v57 }
 0x5ee   :  { %806 = vmatpush.msrb.mxu0 %v1626_v58 }
 0x5f0   :  { %807 = vmatpush.msrb.mxu0 %v1634_v59 }
 0x5f1   :  { %1156 = vmatmul.msk.f32.gmra.mxu0 %vm352_vm3, %v1718_v24 }
 0x5f2   :  { %808 = vmatpush.msrb.mxu0 %v1642_v60  ;;  %v1795_v19 = vpop.f32.mrf.mxu3 }
 0x5f4   :  { %809 = vmatpush.msrb.mxu0 %v1651_v62 }
 0x5f6   :  { %810 = vmatpush.msrb.mxu0 %v1666_v9 }
 0x5f8   :  { %811 = vmatpush.msrb.mxu0 %v1672_v10 }
 0x5fa   :  { %970 = vmatpush.msra.mxu0 %v1554_v48  ;;  %v873_v48 = vpop.f32.mrf.mxu2 }
 0x5fc   :  { %971 = vmatpush.msra.mxu0 %v1559_v49 }
 0x602   :  { %v876_v52 = vpop.f32.mrf.mxu2 }
 0x656   :  { %v782_v24 = vpop.f32.mrf.mxu3 }
 0x657   :  { %v788_v50 = vmul.f32 %v782_v24, %v1684_v12 }
 0x659   :  { %1165 = vmatmul.msk.f32.vlgmr.msrb.gmra.mxu0 %vm284_vm2, %v788_v50 }
 0x65e   :  { %v785_v36 = vpop.f32.mrf.mxu3 }
 0x65f   :  { %v789_v41 = vmul.f32 %v785_v36, %v1691_v15 }
 0x661   :  { %1166 = vmatmul.msk.f32.gmra.mxu0 %vm284_vm2, %v789_v41 }
 0x666   :  { %v912_v55 = vpop.f32.mrf.mxu3  ;;  %v651_v22 = vpop.f32.mrf.mxu0 }
 0x667   :  { %v913_v49 = vadd.f32 %v912_v55, %v873_v48  ;;  %v652_v23 = vadd.f32 %v651_v22, %v620_v4 }
 0x669   :  { %v918_v42 = vmul.f32 0.35355338, %v913_v49 }
 0x66b   :  { %v920_v47 = vadd.f32 %v918_v42, %v1586_v3 }
 0x66d   :  { %v922_v51 = vsel %vm352_vm3, %v920_v47, -inf }
 0x66e   :  { %v915_v53 = vpop.f32.mrf.mxu3  ;;  %923 = vmax.xlane.f32.xlu0 %v922_v51  ;;  %v654_v26 = vpop.f32.mrf.mxu0 }
 0x66f   :  { %v916_v54 = vadd.f32 %v915_v53, %v876_v52  ;;  %v655_v45 = vadd.f32 %v654_v26, %v1795_v19 }
 0x671   :  { %v919_v61 = vmul.f32 0.35355338, %v916_v54 }
 0x673   :  { %v921_v63 = vadd.f32 %v919_v61, %v1593_v11  ;;  %v462_v61 = vadd.f32 %v1793_v2, %v1735_v44 }
 0x675   :  { %v925_v5 = vsel %vm352_vm3, %v921_v63, -inf }
 0x676   :  { %926 = vmax.xlane.f32.xlu2 %v925_v5 }
 0x68e   :  { %1197 = vrot.lane.b32.xlu2 %v1756_v38, %s1266_s8 }
 0x6e1   :  { %v924_v6 = vpop.xlane.xlu0 %923 }
 0x6e2   :  { %v928_v7 = vsub.f32 %v920_v47, %v924_v6 }
 0x6e4   :  { %v930_v8 = vmul.f32 1.442695, %v928_v7 }
 0x6e6   :  { %1231 = vpow2.f32 %v930_v8 }
 0x6e9   :  { %v927_v3 = vpop.xlane.xlu2 %926 }
 0x6ea   :  { %v929_v13 = vsub.f32 %v921_v63, %v927_v3 }
 0x6ec   :  { %v1232_v14 = vpop.eup %1231  ;;  %v932_v16 = vmul.f32 1.442695, %v929_v13 }
 0x6ed   :  { %v934_v17 = vsel %vm352_vm3, %v1232_v14, 0.0 }
 0x6ee   :  { %1233 = vpow2.f32 %v932_v16  ;;  %935 = vadd.xlane.f32.xlu1 %v934_v17 }
 0x6f1   :  { %v1198_v18 = vpop.permute.xlu2 %1197 }
 0x6f2   :  { %v1199_v11 = vunpack.i.l.bf16 %v1198_v18  ;;  %v1200_v39 = vunpack.i.h.bf16 %v1198_v18 }
 0x6f4   :  { %v1234_v20 = vpop.eup %1233  ;;  %839 = vmatpush.msrb.mxu1 %v1199_v11 }
 0x6f5   :  { %v937_v21 = vsel %vm352_vm3, %v1234_v20, 0.0 }
 0x6f6   :  { %840 = vmatpush.msrb.mxu1 %v1200_v39  ;;  %938 = vadd.xlane.f32.xlu0 %v937_v21 }
 0x6f7   :  { %1167 = vmatmul.msk.f32.vlgmr.msrb.gmra.mxu1 %vm352_vm3, %v1762_v33  ;;  %v813_v33 = vpop.f32.mrf.mxu0 }
 0x6f8   :  { %995 = vmatpush.msra.mxu1 %v1614_v56 }
 0x6fa   :  { %996 = vmatpush.msra.mxu1 %v1619_v57 }
 0x6fc   :  { %997 = vmatpush.msra.mxu1 %v1626_v58 }
 0x6fe   :  { %998 = vmatpush.msra.mxu1 %v1634_v59 }
 0x6ff   :  { %1168 = vmatmul.msk.f32.gmra.mxu1 %vm352_vm3, %v1769_v34  ;;  %v816_v29 = vpop.f32.mrf.mxu0 }
 0x700   :  { %999 = vmatpush.msra.mxu1 %v1642_v60 }
 0x702   :  { %1000 = vmatpush.msra.mxu1 %v1651_v62 }
 0x704   :  { %1001 = vmatpush.msra.mxu1 %v1666_v9 }
 0x706   :  { %1002 = vmatpush.msra.mxu1 %v1672_v10 }
 0x707   :  { %1041 = vrot.lane.b32.xlu1 %v652_v23, %s1268_s2 }
 0x70a   :  { %1202 = vrot.lane.b32.xlu0 %v1756_v38, %s1267_s9 }
 0x761   :  { %v936_v56 = vpop.xlane.xlu1 %935 }
 0x762   :  { %1235 = vrcp.f32 %v936_v56 }
 0x768   :  { %v1236_v57 = vpop.eup %1235 }
 0x769   :  { %v942_v58 = vmul.f32 %v1236_v57, %v936_v56  ;;  %v939_v59 = vpop.xlane.xlu0 %938 }
 0x76a   :  { %1237 = vrcp.f32 %v939_v59 }
 0x76b   :  { %v944_v60 = vsub.f32 2.0, %v942_v58 }
 0x76d   :  { %v946_v62 = vmul.f32 %v1236_v57, %v944_v60 }
 0x76f   :  { %v948_v28 = vmul.f32 %v1232_v14, %v946_v62 }
 0x770   :  { %v1238_v9 = vpop.eup %1237 }
 0x771   :  { %v943_v31 = vmul.f32 %v1238_v9, %v939_v59  ;;  %1175 = vmatmul.msk.f32.vlgmr.msra.gmra.mxu0 %vm352_vm3, %v948_v28 }
 0x773   :  { %v945_v10 = vsub.f32 2.0, %v943_v31 }
 0x774   :  { %v842_v32 = vpop.f32.mrf.mxu1 }
 0x775   :  { %v947_v25 = vmul.f32 %v1238_v9, %v945_v10  ;;  %v843_v43 = vadd.f32 %v842_v32, %v813_v33 }
 0x777   :  { %1049 = vrot.lane.b32.xlu2 %v843_v43, %s1269_s13  ;;  %v949_v38 = vmul.f32 %v1234_v20, %v947_v25 }
 0x779   :  { %1176 = vmatmul.msk.f32.gmra.mxu0 %vm352_vm3, %v949_v38  ;;  %v1042_v42 = vpop.permute.xlu1 %1041 }
 0x77c   :  { %v1203_v40 = vpop.permute.xlu0 %1202  ;;  %v845_v19 = vpop.f32.mrf.mxu1 }
 0x77d   :  { %v1204_v34 = vunpack.i.l.bf16 %v1203_v40  ;;  %v1205_v46 = vunpack.i.h.bf16 %v1203_v40  ;;  %v846_v55 = vadd.f32 %v845_v19, %v816_v29 }
 0x77f   :  { %1043 = vrot.lane.b32.xlu2 %v655_v45, %s1268_s2  ;;  %1030 = vmatpush.msra.mxu2 %v1204_v34 }
 0x781   :  { %1031 = vmatpush.msra.mxu2 %v1205_v46 }
 0x782   :  { %1179 = vmatmul.msk.f32.vlgmr.msra.gmra.mxu2 %vm352_vm3, %v948_v28 }
 0x78a   :  { %1180 = vmatmul.msk.f32.gmra.mxu2 %vm352_vm3, %v949_v38 }
 0x7ee   :  { %v973_v30 = vpop.f32.mrf.mxu0 }
 0x7ef   :  { %v979_v35 = vmul.f32 %v973_v30, %v1684_v12  ;;  %v1050_v12 = vpop.permute.xlu2 %1049 }
 0x7f1   :  { %1177 = vmatmul.msk.f32.vlgmr.msra.gmra.mxu1 %vm284_vm2, %v979_v35 }
 0x7f6   :  { %v976_v0 = vpop.f32.mrf.mxu0 }
 0x7f7   :  { %v980_v4 = vmul.f32 %v976_v0, %v1691_v15  ;;  %v459_v15 = vadd.f32 %v1791_v1, %v1733_v37  ;;  %v1044_v54 = vpop.permute.xlu2 %1043 }
 0x7f8   :  { %v1064_v63 = vsel %vm314_vm1, %v462_v61, %v1044_v54 }
 0x7f9   :  { %1178 = vmatmul.msk.f32.gmra.mxu1 %vm284_vm2, %v980_v4  ;;  %v1063_v47 = vsel %vm314_vm1, %v459_v15, %v1042_v42 }
 0x7fa   :  { %v1065_v51 = vsel %vm352_vm3, %v1063_v47, %v1050_v12 }
 0x805   :  { %v1033_v24 = vpop.f32.mrf.mxu2 }
 0x80d   :  { %v1036_v41 = vpop.f32.mrf.mxu2 }
 0x86e   :  { %v1004_v50 = vpop.f32.mrf.mxu1 }
 0x86f   :  { %v1034_v36 = vadd.f32 %v1033_v24, %v1004_v50 }
 0x871   :  { %1057 = vrot.lane.b32.xlu0 %v1034_v36, %s1270_s6 }
 0x876   :  { %v1007_v48 = vpop.f32.mrf.mxu1 }
 0x877   :  { %v1037_v49 = vadd.f32 %v1036_v41, %v1007_v48 }
 0x879   :  { %1059 = vrot.lane.b32.xlu1 %v1037_v49, %s1270_s6  ;;  %1051 = vrot.lane.b32.xlu0 %v846_v55, %s1269_s13 }
 0x8e3   :  { %v1058_v52 = vpop.permute.xlu0 %1057 }
 0x8e4   :  { %v1068_v53 = vsel %vm1067_vm4, %v1065_v51, %v1058_v52 }
 0x8e5   :  { %1181 = vmatmul.msk.f32.vlgmr.msra.gmra.mxu3 %vm52_vm0, %v1068_v53 }
 0x8eb   :  { %v1060_v5 = vpop.permute.xlu1 %1059  ;;  %v1052_v6 = vpop.permute.xlu0 %1051 }
 0x8ec   :  { %v1066_v7 = vsel %vm352_vm3, %v1064_v63, %v1052_v6 }
 0x8ed   :  { %v1069_v37 = vsel %vm1067_vm4, %v1066_v7, %v1060_v5 }
 0x8ee   :  { %1182 = vmatmul.msk.f32.gmra.mxu3 %vm52_vm0, %v1069_v37 }
 0x968   :  { %v1093_v1 = vpop.f32.mrf.mxu3 }
 0x969   :  { %v1094_v8 = vadd.f32 %v1450_v27, %v1093_v1 }
 0x96b   :  { %1099 = vst.msk [vmem:[#allocation2] sm:$0xff] %vm52_vm0, %v1094_v8 }
 0x971   :  { %v1096_v44 = vpop.f32.mrf.mxu3 }
 0x972   :  { %v1097_v2 = vadd.f32 %v1450_v27, %v1096_v44 }
 0x974   :  { %1100 = vst.msk [vmem:[#allocation2 + $0x8] sm:$0xff] %vm52_vm0, %v1097_v2 }
 0x975   :  { %1113 = dma.vmem_to_hbm [thread:$0]  %s1106_s15, 256, %s1108_s17, [#allocation3], %s1272_s11, %s1272_s11, %s1268_s2  }
 0x976   :  { %1263 = dma.done.wait [#allocation3], 256  }
 0x977   :  { %1264 = vsyncadd [#allocation3], 4294967040 }
 0x978   :  { %1118 = vsyncpa [#allocation3], 1 }

</bundles_post_ra>
